<compile_context>
chip_gen: v6e
topology: v6e:2x2x1
jax: 0.10.0
libtpu: 0.0.40
codegen_flags: <defaults>
</compile_context>

<pallas_src>
import functools

import jax
import jax.numpy as jnp
from jax.experimental import pallas as pl
from jax.experimental.pallas import tpu as pltpu

LANE = 128
MAX_TILE_B = 1024
MIN_LOG_STD = -10.0
MAX_LOG_STD = 2.0


def _round_up(n, m):
    return ((n + m - 1) // m) * m


def _choose_batch_tiling(batch, max_tile=MAX_TILE_B):
    """Return (padded_batch, tile_b).

    Small batch -> one grid step (per-step overhead dominates this ~25 MFLOP kernel).
    Large batch -> an even number of tiles (<= max_tile each, sublane-aligned) so the
    'parallel' grid axis shards one tile per TensorCore on v7x.
    """
    batch = max(batch, 1)
    if batch <= max_tile:
        bp = _round_up(batch, 8)
        return bp, bp                              # grid = (1,)
    n_tiles = 2 * (-(-batch // (2 * max_tile)))    # smallest even tile count
    tile = _round_up(-(-batch // n_tiles), 8)
    return n_tiles * tile, tile


def _make_kernel(n_layers, action_size, min_log_std, max_log_std):
    """refs = (x_ref, w_ref, b_ref, out_ref).

    x_ref: bf16 (tile_b, D); w_ref: bf16 (L, D, D); b_ref: f32 (L, 1, D); out_ref: f32 (tile_b, D).
    """

    def kernel(x_ref, w_ref, b_ref, out_ref):
        h = x_ref[...]                                           # bf16 (tile_b, D)
        out = None
        for l in range(n_layers):
            z = jnp.dot(h, w_ref[l], preferred_element_type=jnp.float32) + b_ref[l]
            if l < n_layers - 1:
                h = jnp.maximum(z, 0.0).astype(jnp.bfloat16)     # f32 ReLU, bf16 MXU operand
            else:
                out = z                                          # f32 (tile_b, D)

        # Squash only the log_std lanes (columns [A, 2A)); mu and padding lanes pass through.
        col = jax.lax.broadcasted_iota(jnp.int32, out.shape, 1)
        is_log_std = (col >= action_size) & (col < 2 * action_size)
        squashed = min_log_std + 0.5 * (max_log_std - min_log_std) * (1.0 + jnp.tanh(out))
        out_ref[...] = jnp.where(is_log_std, squashed, out)      # single lane-dense f32 store

    return kernel


def prepare_params(raw_params):
    """Pad every Linear to a common lane-aligned square (D, D) and stack:
    weights -> (L, D, D) bf16, biases -> (L, 1, D) f32."""
    dims = []
    for w, _ in raw_params:
        dims += list(w.shape)
    D = _round_up(max(dims), LANE)
    ws, bs = [], []
    for w, b in raw_params:
        d_in, d_out = w.shape
        w_p = jnp.zeros((D, D), jnp.bfloat16).at[:d_in, :d_out].set(w.astype(jnp.bfloat16))
        b_p = jnp.zeros((1, D), jnp.float32).at[0, :d_out].set(b.reshape(-1).astype(jnp.float32))
        ws.append(w_p)
        bs.append(b_p)
    return jnp.stack(ws), jnp.stack(bs)


@functools.partial(jax.jit, static_argnames=("action_size", "min_log_std", "max_log_std"))
def sac_actor_forward(latent, w_stack, b_stack, action_size,
                      prev_action=None, prev_reward=None,
                      min_log_std=MIN_LOG_STD, max_log_std=MAX_LOG_STD):
    """w_stack/b_stack: output of prepare_params. prev_action/prev_reward unused (interface parity)."""
    del prev_action, prev_reward
    lead_shape = latent.shape[:-1]
    d_in = latent.shape[-1]
    n_layers, D, _ = w_stack.shape
    assert d_in <= D and 2 * action_size <= D

    # Padding / cast / output slicing all live inside this jit so XLA fuses them with the call.
    x = latent.reshape(-1, d_in).astype(jnp.bfloat16)
    batch = x.shape[0]
    batch_p, tile_b = _choose_batch_tiling(batch)
    x_p = jnp.pad(x, ((0, batch_p - batch), (0, D - d_in)))

    kernel = _make_kernel(n_layers, action_size, float(min_log_std), float(max_log_std))

    out = pl.pallas_call(
        kernel,
        out_shape=jax.ShapeDtypeStruct((batch_p, D), jnp.float32),
        grid=(batch_p // tile_b,),
        in_specs=[
            pl.BlockSpec((tile_b, D), lambda i: (i, 0)),            # activations: pipelined over batch
            pl.BlockSpec((n_layers, D, D), lambda i: (0, 0, 0)),    # stacked weights: VMEM-resident
            pl.BlockSpec((n_layers, 1, D), lambda i: (0, 0, 0)),    # stacked biases: VMEM-resident
        ],
        out_specs=pl.BlockSpec((tile_b, D), lambda i: (i, 0)),      # lane-dense single output tile
        compiler_params=pltpu.CompilerParams(dimension_semantics=("parallel",)),
    )(x_p, w_stack, b_stack)

    mu = out[:batch, :action_size].reshape(*lead_shape, action_size)
    log_std = out[:batch, action_size:2 * action_size].reshape(*lead_shape, action_size)
    return mu, log_std


def init_raw_params(key, input_size, hidden_sizes, action_size):
    """Matches SacActorModel init: orthogonal weights, zero biases. Weights stored (in, out)."""
    sizes = [input_size, *hidden_sizes, 2 * action_size]
    keys = jax.random.split(key, len(sizes) - 1)
    ortho = jax.nn.initializers.orthogonal()
    params = []
    for k, di, do in zip(keys, sizes[:-1], sizes[1:]):
        w = ortho(k, (di, do), jnp.float32)
        b = jnp.zeros((do,), jnp.float32)
        params.append((w, b))
    return params


def reference_forward(latent, raw_params, action_size,
                      min_log_std=MIN_LOG_STD, max_log_std=MAX_LOG_STD):
    """Pure-JAX reference using the same bf16-operand / f32-accumulate matmul recipe."""
    h = latent
    n = len(raw_params)
    for l, (w, b) in enumerate(raw_params):
        h = jnp.dot(h.astype(jnp.bfloat16), w.astype(jnp.bfloat16),
                    preferred_element_type=jnp.float32) + b[None, :]
        if l < n - 1:
            h = jnp.maximum(h, 0.0)
    mu = h[:, :action_size]
    log_std = jnp.tanh(h[:, action_size:2 * action_size])
    log_std = min_log_std + 0.5 * (max_log_std - min_log_std) * (1.0 + log_std)
    return mu, log_std


if __name__ == "__main__":
    key = jax.random.PRNGKey(0)
    k_lat, k_act, k_rew, k_par = jax.random.split(key, 4)

    B, INPUT, HID, ACT = 200, 32, 64, 8        # B deliberately not a tile multiple

    latent = jax.random.normal(k_lat, (B, INPUT), jnp.float32)
    prev_action = jax.random.normal(k_act, (B, ACT), jnp.float32)   # unused (interface only)
    prev_reward = jax.random.normal(k_rew, (B,), jnp.float32)       # unused (interface only)

    raw_params = init_raw_params(k_par, INPUT, (HID, HID), ACT)
    w_stack, b_stack = prepare_params(raw_params)

    mu, log_std = sac_actor_forward(latent, w_stack, b_stack, ACT,
                                    prev_action=prev_action, prev_reward=prev_reward)
    jax.block_until_ready((mu, log_std))

    assert mu.shape == (B, ACT)
    assert log_std.shape == (B, ACT)
    assert bool(jnp.all(log_std >= MIN_LOG_STD - 1e-4))
    assert bool(jnp.all(log_std <= MAX_LOG_STD + 1e-4))

    mu_ref, log_std_ref = reference_forward(latent, raw_params, ACT)
    assert jnp.allclose(mu, mu_ref, atol=2e-3, rtol=2e-3), \
        float(jnp.max(jnp.abs(mu - mu_ref)))
    assert jnp.allclose(log_std, log_std_ref, atol=2e-3, rtol=2e-3), \
        float(jnp.max(jnp.abs(log_std - log_std_ref)))

    print("KERNEL_OK")
</pallas_src>

<mosaic_0001>
module attributes {stable_mosaic.version = 11 : i64} {
  func.func @kernel(%arg0: i32, %arg1: memref<200x128xbf16, #tpu.memory_space<vmem>>, %arg2: memref<3x128x128xbf16, #tpu.memory_space<vmem>>, %arg3: memref<3x1x128xf32, #tpu.memory_space<vmem>>, %arg4: memref<200x128xf32, #tpu.memory_space<vmem>>) attributes {dimension_semantics = [#tpu.dimension_semantics<parallel>], iteration_bounds = array<i64: 1>, scalar_prefetch = 0 : i64, scratch_operands = 0 : i64, tpu.core_type = #tpu.core_type<tc>, window_params = [{transform_indices = @transform_0, window_bounds = array<i64: 200, 128>}, {pipeline_mode = #tpu.pipeline_mode<synchronous>, transform_indices = @transform_1, window_bounds = array<i64: 3, 128, 128>}, {pipeline_mode = #tpu.pipeline_mode<synchronous>, transform_indices = @transform_2, window_bounds = array<i64: 3, 1, 128>}, {transform_indices = @transform_3, window_bounds = array<i64: 200, 128>}]} {
    %c0 = arith.constant 0 : index
    %c0_0 = arith.constant 0 : index
    %0 = vector.load %arg1[%c0, %c0_0] : memref<200x128xbf16, #tpu.memory_space<vmem>>, vector<200x128xbf16>
    %c0_1 = arith.constant 0 : index
    %c0_2 = arith.constant 0 : index
    %c0_3 = arith.constant 0 : index
    %1 = vector.load %arg2[%c0_1, %c0_2, %c0_3] : memref<3x128x128xbf16, #tpu.memory_space<vmem>>, vector<1x128x128xbf16>
    %2 = vector.shape_cast %1 : vector<1x128x128xbf16> to vector<128x128xbf16>
    %cst = arith.constant dense<0.000000e+00> : vector<200x128xf32>
    %3 = tpu.matmul %0, %2, %cst {dimension_numbers = #tpu.dot_dimension_numbers<[1], [0], [0], [1], [0, 0, 1, 1], [], []>} : vector<200x128xbf16>, vector<128x128xbf16>, vector<200x128xf32> -> vector<200x128xf32>
    %c0_4 = arith.constant 0 : index
    %c0_5 = arith.constant 0 : index
    %c0_6 = arith.constant 0 : index
    %4 = vector.load %arg3[%c0_4, %c0_5, %c0_6] : memref<3x1x128xf32, #tpu.memory_space<vmem>>, vector<1x1x128xf32>
    %5 = vector.shape_cast %4 : vector<1x1x128xf32> to vector<1x128xf32>
    %6 = vector.broadcast %5 : vector<1x128xf32> to vector<200x128xf32>
    %7 = arith.addf %3, %6 : vector<200x128xf32>
    %cst_7 = arith.constant 0.000000e+00 : f32
    %8 = vector.broadcast %cst_7 : f32 to vector<200x128xf32>
    %9 = arith.maximumf %7, %8 : vector<200x128xf32>
    %10 = arith.truncf %9 : vector<200x128xf32> to vector<200x128xbf16>
    %c1 = arith.constant 1 : index
    %c0_8 = arith.constant 0 : index
    %c0_9 = arith.constant 0 : index
    %11 = vector.load %arg2[%c1, %c0_8, %c0_9] : memref<3x128x128xbf16, #tpu.memory_space<vmem>>, vector<1x128x128xbf16>
    %12 = vector.shape_cast %11 : vector<1x128x128xbf16> to vector<128x128xbf16>
    %cst_10 = arith.constant dense<0.000000e+00> : vector<200x128xf32>
    %13 = tpu.matmul %10, %12, %cst_10 {dimension_numbers = #tpu.dot_dimension_numbers<[1], [0], [0], [1], [0, 0, 1, 1], [], []>} : vector<200x128xbf16>, vector<128x128xbf16>, vector<200x128xf32> -> vector<200x128xf32>
    %c1_11 = arith.constant 1 : index
    %c0_12 = arith.constant 0 : index
    %c0_13 = arith.constant 0 : index
    %14 = vector.load %arg3[%c1_11, %c0_12, %c0_13] : memref<3x1x128xf32, #tpu.memory_space<vmem>>, vector<1x1x128xf32>
    %15 = vector.shape_cast %14 : vector<1x1x128xf32> to vector<1x128xf32>
    %16 = vector.broadcast %15 : vector<1x128xf32> to vector<200x128xf32>
    %17 = arith.addf %13, %16 : vector<200x128xf32>
    %cst_14 = arith.constant 0.000000e+00 : f32
    %18 = vector.broadcast %cst_14 : f32 to vector<200x128xf32>
    %19 = arith.maximumf %17, %18 : vector<200x128xf32>
    %20 = arith.truncf %19 : vector<200x128xf32> to vector<200x128xbf16>
    %c2 = arith.constant 2 : index
    %c0_15 = arith.constant 0 : index
    %c0_16 = arith.constant 0 : index
    %21 = vector.load %arg2[%c2, %c0_15, %c0_16] : memref<3x128x128xbf16, #tpu.memory_space<vmem>>, vector<1x128x128xbf16>
    %22 = vector.shape_cast %21 : vector<1x128x128xbf16> to vector<128x128xbf16>
    %cst_17 = arith.constant dense<0.000000e+00> : vector<200x128xf32>
    %23 = tpu.matmul %20, %22, %cst_17 {dimension_numbers = #tpu.dot_dimension_numbers<[1], [0], [0], [1], [0, 0, 1, 1], [], []>} : vector<200x128xbf16>, vector<128x128xbf16>, vector<200x128xf32> -> vector<200x128xf32>
    %c2_18 = arith.constant 2 : index
    %c0_19 = arith.constant 0 : index
    %c0_20 = arith.constant 0 : index
    %24 = vector.load %arg3[%c2_18, %c0_19, %c0_20] : memref<3x1x128xf32, #tpu.memory_space<vmem>>, vector<1x1x128xf32>
    %25 = vector.shape_cast %24 : vector<1x1x128xf32> to vector<1x128xf32>
    %26 = vector.broadcast %25 : vector<1x128xf32> to vector<200x128xf32>
    %27 = arith.addf %23, %26 : vector<200x128xf32>
    %28 = tpu.iota {dimensions = array<i32: 1>} : vector<200x128xi32>
    %c8_i32 = arith.constant 8 : i32
    %29 = vector.broadcast %c8_i32 : i32 to vector<200x128xi32>
    %30 = arith.cmpi sge, %28, %29 : vector<200x128xi32>
    %c16_i32 = arith.constant 16 : i32
    %31 = vector.broadcast %c16_i32 : i32 to vector<200x128xi32>
    %32 = arith.cmpi slt, %28, %31 : vector<200x128xi32>
    %33 = arith.andi %30, %32 : vector<200x128xi1>
    %34 = math.tanh %27 : vector<200x128xf32>
    %cst_21 = arith.constant 1.000000e+00 : f32
    %35 = vector.broadcast %cst_21 : f32 to vector<200x128xf32>
    %36 = arith.addf %35, %34 : vector<200x128xf32>
    %cst_22 = arith.constant 6.000000e+00 : f32
    %37 = vector.broadcast %cst_22 : f32 to vector<200x128xf32>
    %38 = arith.mulf %37, %36 : vector<200x128xf32>
    %cst_23 = arith.constant -1.000000e+01 : f32
    %39 = vector.broadcast %cst_23 : f32 to vector<200x128xf32>
    %40 = arith.addf %39, %38 : vector<200x128xf32>
    %41 = arith.select %33, %40, %27 : vector<200x128xi1>, vector<200x128xf32>
    %c0_24 = arith.constant 0 : index
    %c0_25 = arith.constant 0 : index
    %42 = vector.load %arg4[%c0_24, %c0_25] : memref<200x128xf32, #tpu.memory_space<vmem>>, vector<200x128xf32>
    tpu.vector_store %arg4[%c0_24, %c0_25], %41 {strides = array<i32>} : memref<200x128xf32, #tpu.memory_space<vmem>>, vector<200x128xf32>,
    return
  }
  func.func @transform_0(%arg0: i32) -> (i32, i32) {
    %c0_i32 = arith.constant 0 : i32
    %c0_i32_0 = arith.constant 0 : i32
    return %arg0, %c0_i32 : i32, i32
  }
  func.func @transform_1(%arg0: i32) -> (i32, i32, i32) {
    %c0_i32 = arith.constant 0 : i32
    %c0_i32_0 = arith.constant 0 : i32
    %c0_i32_1 = arith.constant 0 : i32
    %c0_i32_2 = arith.constant 0 : i32
    return %c0_i32, %c0_i32_0, %c0_i32_1 : i32, i32, i32
  }
  func.func @transform_2(%arg0: i32) -> (i32, i32, i32) {
    %c0_i32 = arith.constant 0 : i32
    %c0_i32_0 = arith.constant 0 : i32
    %c0_i32_1 = arith.constant 0 : i32
    %c0_i32_2 = arith.constant 0 : i32
    return %c0_i32, %c0_i32_0, %c0_i32_1 : i32, i32, i32
  }
  func.func @transform_3(%arg0: i32) -> (i32, i32) {
    %c0_i32 = arith.constant 0 : i32
    %c0_i32_0 = arith.constant 0 : i32
    return %arg0, %c0_i32 : i32, i32
  }
}

</mosaic_0001>

<bundles_post_ra>
// kernel: sac_actor_forward.1
= control target key start
LH: loop header
LB: loop body
LE: loop exit
PB: predicated region body
PF: predicated region fallthrough
CT: control target
= control target key end

     0   :  { %v1422_v0 = vmov 0.0   ;;  %vm1423_vm0 = vmmov 0   ;;  %s1914_s1 = inlined_call_operand.vmem [shape: bf16[3,128,128], index: 1, kind: input, shape index: {}]   ;;  %s1915_s0 = inlined_call_operand.vmem [shape: bf16[200,128], index: 0, kind: input, shape index: {}]   ;;  %s1916_s2 = inlined_call_operand.vmem [shape: f32[3,1,128], index: 2, kind: input, shape index: {}]   ;;  %s1917_s3 = inlined_call_operand.vmem [shape: f32[200,128], index: 3, kind: output, shape index: {}]  }
   0x1   :  { %1113 = vmatprep.subr.bf16.mxu0 %v1422_v0  ;;  %v1335_v1 = vld [vmem:[%s1914_s1 + $0x38] sm:$0xff]   ;;  %1129 = vmatprep.mubr.msk.bf16.mxu0 %vm1423_vm0, %v1422_v0  ;;  %v1336_v2 = vld [vmem:[%s1914_s1 + $0x30] sm:$0xff]   ;;  %v1337_v3 = vld [vmem:[%s1914_s1 + $0x28] sm:$0xff]  }
   0x2   :  { %1317 = vmatprep.subr.bf16.mxu1 %v1422_v0  ;;  %1157 = vmatprep.mubr.msk.bf16.mxu1 %vm1423_vm0, %v1422_v0  ;;  %v1338_v4 = vld [vmem:[%s1914_s1 + $0x20] sm:$0xff]   ;;  %v1339_v5 = vld [vmem:[%s1914_s1 + $0x18] sm:$0xff]   ;;  %v1340_v6 = vld [vmem:[%s1914_s1 + $0x10] sm:$0xff]  }
   0x3   :  { %1114 = vmatpush3.bf16.msra.mxu0 %v1335_v1  ;;  %1325 = vmatpush3.bf16.msra.mxu1 %v1335_v1  ;;  %v1341_v7 = vld [vmem:[%s1914_s1 + $0x8] sm:$0xff]   ;;  %v1342_v8 = vld [vmem:[%s1914_s1] sm:$0xff]   ;;  %v1350_v10 = vld [vmem:[%s1915_s0 + $0x38] sm:$0xff]  }
   0x4   :  { %1115 = vmatprep.subr.bf16.mxu0 %v1422_v0  ;;  %1318 = vmatprep.subr.bf16.mxu1 %v1422_v0  ;;  %v1343_v9 = vld [vmem:[%s1915_s0] sm:$0xff]   ;;  %v1356_v11 = vld [vmem:[%s1914_s1 + $0x78] sm:$0xff]   ;;  %v1357_v12 = vld [vmem:[%s1914_s1 + $0x70] sm:$0xff]  }
   0x5   :  { %v1344_v13 = vld [vmem:[%s1915_s0 + $0x8] sm:$0xff]   ;;  %v1351_v14 = vld [vmem:[%s1915_s0 + $0x40] sm:$0xff]   ;;  %v1345_v17 = vld [vmem:[%s1915_s0 + $0x10] sm:$0xff]  }
   0x6   :  { %v1358_v15 = vld [vmem:[%s1914_s1 + $0x68] sm:$0xff]   ;;  %v1359_v16 = vld [vmem:[%s1914_s1 + $0x60] sm:$0xff]   ;;  %v1360_v19 = vld [vmem:[%s1914_s1 + $0x58] sm:$0xff]  }
   0x7   :  { %1116 = vmatpush3.bf16.msra.mxu0 %v1336_v2  ;;  %1326 = vmatpush3.bf16.msra.mxu1 %v1336_v2  ;;  %v1352_v18 = vld [vmem:[%s1915_s0 + $0x48] sm:$0xff]   ;;  %v1361_v20 = vld [vmem:[%s1914_s1 + $0x50] sm:$0xff]   ;;  %v1346_v21 = vld [vmem:[%s1915_s0 + $0x18] sm:$0xff]  }
   0x8   :  { %1117 = vmatprep.subr.bf16.mxu0 %v1422_v0  ;;  %1319 = vmatprep.subr.bf16.mxu1 %v1422_v0  ;;  %v1353_v22 = vld [vmem:[%s1915_s0 + $0x50] sm:$0xff]   ;;  %v1362_v23 = vld [vmem:[%s1914_s1 + $0x48] sm:$0xff]   ;;  %v1347_v24 = vld [vmem:[%s1915_s0 + $0x20] sm:$0xff]  }
   0x9   :  { %v1354_v25 = vld [vmem:[%s1915_s0 + $0x58] sm:$0xff]   ;;  %v1348_v26 = vld [vmem:[%s1915_s0 + $0x28] sm:$0xff]   ;;  %v1355_v27 = vld [vmem:[%s1915_s0 + $0x60] ss:$0 sps:$4 sm:$0xff]  }
   0xa   :  { %v1349_v28 = vld [vmem:[%s1915_s0 + $0x30] sm:$0xff]   ;;  %v1363_v29 = vld [vmem:[%s1914_s1 + $0x40] sm:$0xff]   ;;  %v1364_v30 = vld [vmem:[%s1914_s1 + $0xb8] sm:$0xff]  }
   0xb   :  { %1118 = vmatpush3.bf16.msra.mxu0 %v1337_v3  ;;  %1327 = vmatpush3.bf16.msra.mxu1 %v1337_v3  ;;  %v1365_v31 = vld [vmem:[%s1914_s1 + $0xb0] sm:$0xff]   ;;  %v1366_v32 = vld [vmem:[%s1914_s1 + $0xa8] sm:$0xff]   ;;  %v1367_v33 = vld [vmem:[%s1914_s1 + $0xa0] sm:$0xff]  }
   0xc   :  { %1119 = vmatprep.subr.bf16.mxu0 %v1422_v0  ;;  %1320 = vmatprep.subr.bf16.mxu1 %v1422_v0  ;;  %v1368_v34 = vld [vmem:[%s1914_s1 + $0x98] sm:$0xff]   ;;  %v1369_v35 = vld [vmem:[%s1914_s1 + $0x90] sm:$0xff]   ;;  %v1612_v36 = vld [vmem:[%s1916_s2] ss:$0 sm:$0xff] }
   0xd   :  { %v1370_v39 = vld [vmem:[%s1914_s1 + $0x88] sm:$0xff]  }
   0xf   :  { %1120 = vmatpush3.bf16.msra.mxu0 %v1338_v4  ;;  %1328 = vmatpush3.bf16.msra.mxu1 %v1338_v4 }
  0x10   :  { %1121 = vmatprep.subr.bf16.mxu0 %v1422_v0  ;;  %1321 = vmatprep.subr.bf16.mxu1 %v1422_v0 }
  0x13   :  { %1122 = vmatpush3.bf16.msra.mxu0 %v1339_v5  ;;  %1329 = vmatpush3.bf16.msra.mxu1 %v1339_v5 }
  0x14   :  { %1123 = vmatprep.subr.bf16.mxu0 %v1422_v0  ;;  %1322 = vmatprep.subr.bf16.mxu1 %v1422_v0 }
  0x17   :  { %1124 = vmatpush3.bf16.msra.mxu0 %v1340_v6  ;;  %1330 = vmatpush3.bf16.msra.mxu1 %v1340_v6 }
  0x18   :  { %1125 = vmatprep.subr.bf16.mxu0 %v1422_v0  ;;  %1323 = vmatprep.subr.bf16.mxu1 %v1422_v0 }
  0x1b   :  { %1126 = vmatpush3.bf16.msra.mxu0 %v1341_v7  ;;  %1331 = vmatpush3.bf16.msra.mxu1 %v1341_v7 }
  0x1c   :  { %1127 = vmatprep.subr.bf16.mxu0 %v1422_v0  ;;  %1324 = vmatprep.subr.bf16.mxu1 %v1422_v0 }
  0x1f   :  { %1128 = vmatpush3.bf16.msra.mxu0 %v1342_v8  ;;  %1332 = vmatpush3.bf16.msra.mxu1 %v1342_v8 }
  0x20   :  { %1181 = vmatprep.subr.bf16.mxu1 %v1422_v0  ;;  %1249 = vmatprep.subr.bf16.mxu0 %v1422_v0 }
  0x22   :  { %1130 = vmatmul.mubr.bf16.vlgmr.msra.gmra.mxu0 %v1343_v9  ;;  %1158 = vmatmul.mubr.bf16.vlgmr.msra.gmra.mxu1 %v1350_v10 }
  0x23   :  { %1133 = vmatprep.mubr.msk.bf16.mxu0 %vm1423_vm0, %v1422_v0  ;;  %1161 = vmatprep.mubr.msk.bf16.mxu1 %vm1423_vm0, %v1422_v0 }
  0x24   :  { %1182 = vmatpush3.bf16.msra.mxu1 %v1356_v11  ;;  %1250 = vmatpush3.bf16.msra.mxu0 %v1364_v30 }
  0x25   :  { %1183 = vmatprep.subr.bf16.mxu1 %v1422_v0  ;;  %1251 = vmatprep.subr.bf16.mxu0 %v1422_v0 }
  0x28   :  { %1184 = vmatpush3.bf16.msra.mxu1 %v1357_v12  ;;  %1252 = vmatpush3.bf16.msra.mxu0 %v1365_v31 }
  0x29   :  { %1185 = vmatprep.subr.bf16.mxu1 %v1422_v0  ;;  %1253 = vmatprep.subr.bf16.mxu0 %v1422_v0 }
  0x2a   :  { %1134 = vmatmul.mubr.bf16.gmra.mxu0 %v1344_v13  ;;  %1162 = vmatmul.mubr.bf16.gmra.mxu1 %v1351_v14 }
  0x2b   :  { %1137 = vmatprep.mubr.msk.bf16.mxu0 %vm1423_vm0, %v1422_v0  ;;  %1165 = vmatprep.mubr.msk.bf16.mxu1 %vm1423_vm0, %v1422_v0 }
  0x2c   :  { %1186 = vmatpush3.bf16.msra.mxu1 %v1358_v15  ;;  %1254 = vmatpush3.bf16.msra.mxu0 %v1366_v32 }
  0x2d   :  { %1187 = vmatprep.subr.bf16.mxu1 %v1422_v0  ;;  %1255 = vmatprep.subr.bf16.mxu0 %v1422_v0 }
  0x30   :  { %1188 = vmatpush3.bf16.msra.mxu1 %v1359_v16  ;;  %1256 = vmatpush3.bf16.msra.mxu0 %v1367_v33 }
  0x31   :  { %1189 = vmatprep.subr.bf16.mxu1 %v1422_v0  ;;  %1257 = vmatprep.subr.bf16.mxu0 %v1422_v0 }
  0x32   :  { %1138 = vmatmul.mubr.bf16.gmra.mxu0 %v1345_v17  ;;  %1166 = vmatmul.mubr.bf16.gmra.mxu1 %v1352_v18 }
  0x33   :  { %1141 = vmatprep.mubr.msk.bf16.mxu0 %vm1423_vm0, %v1422_v0  ;;  %1169 = vmatprep.mubr.msk.bf16.mxu1 %vm1423_vm0, %v1422_v0 }
  0x34   :  { %1190 = vmatpush3.bf16.msra.mxu1 %v1360_v19  ;;  %1258 = vmatpush3.bf16.msra.mxu0 %v1368_v34 }
  0x35   :  { %1191 = vmatprep.subr.bf16.mxu1 %v1422_v0  ;;  %1259 = vmatprep.subr.bf16.mxu0 %v1422_v0 }
  0x38   :  { %1192 = vmatpush3.bf16.msra.mxu1 %v1361_v20  ;;  %1260 = vmatpush3.bf16.msra.mxu0 %v1369_v35 }
  0x39   :  { %1193 = vmatprep.subr.bf16.mxu1 %v1422_v0  ;;  %1261 = vmatprep.subr.bf16.mxu0 %v1422_v0 }
  0x3a   :  { %1142 = vmatmul.mubr.bf16.gmra.mxu0 %v1346_v21  ;;  %1170 = vmatmul.mubr.bf16.gmra.mxu1 %v1353_v22 }
  0x3b   :  { %1145 = vmatprep.mubr.msk.bf16.mxu0 %vm1423_vm0, %v1422_v0  ;;  %1173 = vmatprep.mubr.msk.bf16.mxu1 %vm1423_vm0, %v1422_v0 }
  0x3c   :  { %1194 = vmatpush3.bf16.msra.mxu1 %v1362_v23  ;;  %1262 = vmatpush3.bf16.msra.mxu0 %v1370_v39 }
  0x3d   :  { %1195 = vmatprep.subr.bf16.mxu1 %v1422_v0  ;;  %1263 = vmatprep.subr.bf16.mxu0 %v1422_v0 }
  0x40   :  { %1196 = vmatpush3.bf16.msra.mxu1 %v1363_v29 }
  0x42   :  { %1146 = vmatmul.mubr.bf16.gmra.mxu0 %v1347_v24  ;;  %1174 = vmatmul.mubr.bf16.gmra.mxu1 %v1354_v25 }
  0x43   :  { %1149 = vmatprep.mubr.msk.bf16.mxu0 %vm1423_vm0, %v1422_v0  ;;  %1177 = vmatprep.mubr.msk.bf16.mxu1 %vm1423_vm0, %v1422_v0 }
  0x4a   :  { %1150 = vmatmul.mubr.bf16.gmra.mxu0 %v1348_v26  ;;  %1178 = vmatmul.mubr.bf16.gmra.mxu1 %v1355_v27 }
  0x4b   :  { %1153 = vmatprep.mubr.msk.bf16.mxu0 %vm1423_vm0, %v1422_v0  ;;  %1197 = vmatprep.mubr.msk.bf16.mxu1 %vm1423_vm0, %v1422_v0 }
  0x52   :  { %1154 = vmatmul.mubr.bf16.gmra.mxu0 %v1349_v28 }
  0x53   :  { %1265 = vmatprep.mubr.msk.bf16.mxu0 %vm1423_vm0, %v1422_v0 }
  0xe2   :  { %v221_v37 = vpop.f32.mrf.mxu0  ;;  %v1614_v38 = vpop.f32.mrf.mxu1 }
  0xe3   :  { %v222_v42 = vadd.f32 %v1612_v36, %v221_v37 }
  0xe4   :  { %v1131_v40 = vpop.f32.mrf.mxu0  ;;  %v1159_v41 = vpop.f32.mrf.mxu1 }
  0xe5   :  { %v323_v48 = vmax.f32 %v222_v42, 0.0 }
  0xe6   :  { %v224_v43 = vpop.f32.mrf.mxu0  ;;  %v1621_v44 = vpop.f32.mrf.mxu1 }
  0xe7   :  { %v225_v45 = vadd.f32 %v1612_v36, %v224_v43 }
  0xe8   :  { %v1132_v46 = vpop.f32.mrf.mxu0  ;;  %v1160_v47 = vpop.f32.mrf.mxu1 }
  0xe9   :  { %v324_v49 = vmax.f32 %v225_v45, 0.0 }
  0xea   :  { %v229_v50 = vpop.f32.mrf.mxu0  ;;  %v1625_v51 = vpop.f32.mrf.mxu1 }
  0xeb   :  { %v348_v52 = vpack.c.bf16 %v324_v49, %v323_v48  ;;  %v230_v55 = vadd.f32 %v1612_v36, %v229_v50 }
  0xec   :  { %v1135_v53 = vpop.f32.mrf.mxu0  ;;  %v1163_v54 = vpop.f32.mrf.mxu1 }
  0xed   :  { %1198 = vmatmul.mubr.bf16.vlgmr.msra.gmra.mxu1 %v348_v52  ;;  %v325_v61 = vmax.f32 %v230_v55, 0.0 }
  0xee   :  { %v232_v56 = vpop.f32.mrf.mxu0  ;;  %1201 = vmatprep.mubr.msk.bf16.mxu1 %vm1423_vm0, %v1422_v0  ;;  %v1630_v57 = vpop.f32.mrf.mxu1 }
  0xef   :  { %v233_v58 = vadd.f32 %v1612_v36, %v232_v56 }
  0xf0   :  { %v1136_v59 = vpop.f32.mrf.mxu0  ;;  %v1164_v60 = vpop.f32.mrf.mxu1 }
  0xf1   :  { %v326_v62 = vmax.f32 %v233_v58, 0.0 }
  0xf2   :  { %v237_v63 = vpop.f32.mrf.mxu0  ;;  %v1633_v1 = vpop.f32.mrf.mxu1 }
  0xf3   :  { %v349_v2 = vpack.c.bf16 %v326_v62, %v325_v61  ;;  %v238_v5 = vadd.f32 %v1612_v36, %v237_v63 }
  0xf4   :  { %v1139_v3 = vpop.f32.mrf.mxu0  ;;  %v1167_v4 = vpop.f32.mrf.mxu1 }
  0xf5   :  { %1202 = vmatmul.mubr.bf16.gmra.mxu1 %v349_v2  ;;  %v327_v11 = vmax.f32 %v238_v5, 0.0  ;;  %v278_v4 = vadd.f32 %v1612_v36, %v1614_v38 }
  0xf6   :  { %v240_v6 = vpop.f32.mrf.mxu0  ;;  %1205 = vmatprep.mubr.msk.bf16.mxu1 %vm1423_vm0, %v1422_v0  ;;  %v1638_v7 = vpop.f32.mrf.mxu1 }
  0xf7   :  { %v241_v8 = vadd.f32 %v1612_v36, %v240_v6  ;;  %v281_v6 = vadd.f32 %v1612_v36, %v1621_v44 }
  0xf8   :  { %v1140_v9 = vpop.f32.mrf.mxu0  ;;  %v1168_v10 = vpop.f32.mrf.mxu1 }
  0xf9   :  { %v328_v12 = vmax.f32 %v241_v8, 0.0  ;;  %v337_v8 = vmax.f32 %v278_v4, 0.0  ;;  %v338_v9 = vmax.f32 %v281_v6, 0.0 }
  0xfa   :  { %v245_v13 = vpop.f32.mrf.mxu0  ;;  %v1641_v14 = vpop.f32.mrf.mxu1 }
  0xfb   :  { %v350_v15 = vpack.c.bf16 %v328_v12, %v327_v11  ;;  %v246_v18 = vadd.f32 %v1612_v36, %v245_v13  ;;  %v355_v10 = vpack.c.bf16 %v338_v9, %v337_v8  ;;  %v286_v11 = vadd.f32 %v1612_v36, %v1625_v51 }
  0xfc   :  { %v1143_v16 = vpop.f32.mrf.mxu0  ;;  %v1171_v17 = vpop.f32.mrf.mxu1  ;;  %v289_v12 = vadd.f32 %v1612_v36, %v1630_v57 }
  0xfd   :  { %1206 = vmatmul.mubr.bf16.gmra.mxu1 %v350_v15  ;;  %v329_v24 = vmax.f32 %v246_v18, 0.0  ;;  %v339_v38 = vmax.f32 %v286_v11, 0.0  ;;  %v294_v15 = vadd.f32 %v1612_v36, %v1633_v1  ;;  %v297_v16 = vadd.f32 %v1612_v36, %v1638_v7  ;;  %v1371_v1 = vld [vmem:[%s1914_s1 + $0x80] sm:$0xff]  }
  0xfe   :  { %v248_v19 = vpop.f32.mrf.mxu0  ;;  %1209 = vmatprep.mubr.msk.bf16.mxu1 %vm1423_vm0, %v1422_v0  ;;  %v1646_v20 = vpop.f32.mrf.mxu1  ;;  %v340_v13 = vmax.f32 %v289_v12, 0.0  ;;  %v302_v18 = vadd.f32 %v1612_v36, %v1641_v14  ;;  %1264 = vmatpush3.bf16.msra.mxu0 %v1371_v1 }
  0xff   :  { %v249_v21 = vadd.f32 %v1612_v36, %v248_v19  ;;  %v341_v51 = vmax.f32 %v294_v15, 0.0  ;;  %v342_v17 = vmax.f32 %v297_v16, 0.0  ;;  %v305_v19 = vadd.f32 %v1612_v36, %v1646_v20 }
 0x100   :  { %v1144_v22 = vpop.f32.mrf.mxu0  ;;  %v1172_v23 = vpop.f32.mrf.mxu1  ;;  %v356_v44 = vpack.c.bf16 %v340_v13, %v339_v38  ;;  %v343_v7 = vmax.f32 %v302_v18, 0.0 }
 0x101   :  { %v330_v25 = vmax.f32 %v249_v21, 0.0  ;;  %v357_v57 = vpack.c.bf16 %v342_v17, %v341_v51  ;;  %v344_v21 = vmax.f32 %v305_v19, 0.0 }
 0x102   :  { %v253_v26 = vpop.f32.mrf.mxu0  ;;  %v1649_v27 = vpop.f32.mrf.mxu1 }
 0x103   :  { %v351_v28 = vpack.c.bf16 %v330_v25, %v329_v24  ;;  %v254_v31 = vadd.f32 %v1612_v36, %v253_v26  ;;  %v358_v22 = vpack.c.bf16 %v344_v21, %v343_v7  ;;  %v310_v23 = vadd.f32 %v1612_v36, %v1649_v27  ;;  %v1704_v27 = vld [vmem:[%s1916_s2 + $0x1] ss:$0 sm:$0xff] }
 0x104   :  { %v1147_v29 = vpop.f32.mrf.mxu0  ;;  %v1175_v30 = vpop.f32.mrf.mxu1 }
 0x105   :  { %1210 = vmatmul.mubr.bf16.gmra.mxu1 %v351_v28  ;;  %v331_v39 = vmax.f32 %v254_v31, 0.0  ;;  %v345_v20 = vmax.f32 %v310_v23, 0.0 }
 0x106   :  { %v256_v32 = vpop.f32.mrf.mxu0  ;;  %1213 = vmatprep.mubr.msk.bf16.mxu1 %vm1423_vm0, %v1422_v0  ;;  %v1654_v33 = vpop.f32.mrf.mxu1 }
 0x107   :  { %v257_v34 = vadd.f32 %v1612_v36, %v256_v32  ;;  %v313_v14 = vadd.f32 %v1612_v36, %v1654_v33 }
 0x108   :  { %v1148_v35 = vpop.f32.mrf.mxu0  ;;  %v1176_v37 = vpop.f32.mrf.mxu1 }
 0x109   :  { %v332_v40 = vmax.f32 %v257_v34, 0.0  ;;  %v346_v24 = vmax.f32 %v313_v14, 0.0 }
 0x10a   :  { %v261_v41 = vpop.f32.mrf.mxu0  ;;  %v317_v42 = vpop.f32.mrf.mxu1 }
 0x10b   :  { %v352_v43 = vpack.c.bf16 %v332_v40, %v331_v39  ;;  %v262_v47 = vadd.f32 %v1612_v36, %v261_v41  ;;  %v318_v25 = vadd.f32 %v1612_v36, %v317_v42  ;;  %v359_v26 = vpack.c.bf16 %v346_v24, %v345_v20 }
 0x10c   :  { %v1151_v45 = vpop.f32.mrf.mxu0  ;;  %v1179_v46 = vpop.f32.mrf.mxu1 }
 0x10d   :  { %1214 = vmatmul.mubr.bf16.gmra.mxu1 %v352_v43  ;;  %v333_v54 = vmax.f32 %v262_v47, 0.0  ;;  %v347_v28 = vmax.f32 %v318_v25, 0.0 }
 0x10e   :  { %v264_v48 = vpop.f32.mrf.mxu0  ;;  %1217 = vmatprep.mubr.msk.bf16.mxu1 %vm1423_vm0, %v1422_v0  ;;  %v320_v49 = vpop.f32.mrf.mxu1 }
 0x10f   :  { %v265_v50 = vadd.f32 %v1612_v36, %v264_v48  ;;  %v360_v29 = vpack.c.bf16 %v347_v28, %v347_v28 }
 0x110   :  { %v1152_v52 = vpop.f32.mrf.mxu0  ;;  %v1180_v53 = vpop.f32.mrf.mxu1 }
 0x111   :  { %v334_v55 = vmax.f32 %v265_v50, 0.0 }
 0x112   :  { %v269_v56 = vpop.f32.mrf.mxu0 }
 0x113   :  { %v353_v58 = vpack.c.bf16 %v334_v55, %v333_v54  ;;  %v270_v60 = vadd.f32 %v1612_v36, %v269_v56 }
 0x114   :  { %v1155_v59 = vpop.f32.mrf.mxu0 }
 0x115   :  { %1218 = vmatmul.mubr.bf16.gmra.mxu1 %v353_v58  ;;  %v335_v2 = vmax.f32 %v270_v60, 0.0 }
 0x116   :  { %v272_v61 = vpop.f32.mrf.mxu0  ;;  %1221 = vmatprep.mubr.msk.bf16.mxu1 %vm1423_vm0, %v1422_v0 }
 0x117   :  { %v273_v62 = vadd.f32 %v1612_v36, %v272_v61 }
 0x118   :  { %v1156_v63 = vpop.f32.mrf.mxu0 }
 0x119   :  { %v336_v3 = vmax.f32 %v273_v62, 0.0 }
 0x11b   :  { %v354_v5 = vpack.c.bf16 %v336_v3, %v335_v2 }
 0x11d   :  { %1222 = vmatmul.mubr.bf16.gmra.mxu1 %v354_v5 }
 0x11e   :  { %1225 = vmatprep.mubr.msk.bf16.mxu1 %vm1423_vm0, %v1422_v0 }
 0x125   :  { %1226 = vmatmul.mubr.bf16.gmra.mxu1 %v355_v10 }
 0x126   :  { %1229 = vmatprep.mubr.msk.bf16.mxu1 %vm1423_vm0, %v1422_v0 }
 0x12d   :  { %1230 = vmatmul.mubr.bf16.gmra.mxu1 %v356_v44 }
 0x12e   :  { %1233 = vmatprep.mubr.msk.bf16.mxu1 %vm1423_vm0, %v1422_v0 }
 0x135   :  { %1234 = vmatmul.mubr.bf16.gmra.mxu1 %v357_v57 }
 0x136   :  { %1237 = vmatprep.mubr.msk.bf16.mxu1 %vm1423_vm0, %v1422_v0 }
 0x13d   :  { %1238 = vmatmul.mubr.bf16.gmra.mxu1 %v358_v22 }
 0x13e   :  { %1241 = vmatprep.mubr.msk.bf16.mxu1 %vm1423_vm0, %v1422_v0 }
 0x145   :  { %1242 = vmatmul.mubr.bf16.gmra.mxu1 %v359_v26 }
 0x146   :  { %1245 = vmatprep.mubr.msk.bf16.mxu1 %vm1423_vm0, %v1422_v0 }
 0x14d   :  { %1246 = vmatmul.mubr.bf16.gmra.mxu1 %v360_v29 }
 0x1ad   :  { %v468_v30 = vpop.f32.mrf.mxu1 }
 0x1ae   :  { %v469_v32 = vadd.f32 %v1704_v27, %v468_v30 }
 0x1af   :  { %v1199_v31 = vpop.f32.mrf.mxu1 }
 0x1b0   :  { %v570_v35 = vmax.f32 %v469_v32, 0.0 }
 0x1b1   :  { %v471_v33 = vpop.f32.mrf.mxu1 }
 0x1b2   :  { %v472_v36 = vadd.f32 %v1704_v27, %v471_v33 }
 0x1b3   :  { %v1200_v34 = vpop.f32.mrf.mxu1 }
 0x1b4   :  { %v571_v37 = vmax.f32 %v472_v36, 0.0 }
 0x1b5   :  { %v476_v39 = vpop.f32.mrf.mxu1 }
 0x1b6   :  { %v595_v40 = vpack.c.bf16 %v571_v37, %v570_v35  ;;  %v477_v42 = vadd.f32 %v1704_v27, %v476_v39 }
 0x1b7   :  { %v1203_v41 = vpop.f32.mrf.mxu1 }
 0x1b8   :  { %1266 = vmatmul.mubr.bf16.vlgmr.msra.gmra.mxu0 %v595_v40  ;;  %v572_v47 = vmax.f32 %v477_v42, 0.0 }
 0x1b9   :  { %v479_v43 = vpop.f32.mrf.mxu1  ;;  %1269 = vmatprep.mubr.msk.bf16.mxu0 %vm1423_vm0, %v1422_v0 }
 0x1ba   :  { %v480_v45 = vadd.f32 %v1704_v27, %v479_v43 }
 0x1bb   :  { %v1204_v46 = vpop.f32.mrf.mxu1 }
 0x1bc   :  { %v573_v48 = vmax.f32 %v480_v45, 0.0 }
 0x1bd   :  { %v484_v49 = vpop.f32.mrf.mxu1 }
 0x1be   :  { %v596_v50 = vpack.c.bf16 %v573_v48, %v572_v47  ;;  %v485_v53 = vadd.f32 %v1704_v27, %v484_v49 }
 0x1bf   :  { %v1207_v52 = vpop.f32.mrf.mxu1 }
 0x1c0   :  { %1270 = vmatmul.mubr.bf16.gmra.mxu0 %v596_v50  ;;  %v574_v58 = vmax.f32 %v485_v53, 0.0 }
 0x1c1   :  { %v487_v54 = vpop.f32.mrf.mxu1  ;;  %1273 = vmatprep.mubr.msk.bf16.mxu0 %vm1423_vm0, %v1422_v0 }
 0x1c2   :  { %v488_v55 = vadd.f32 %v1704_v27, %v487_v54 }
 0x1c3   :  { %v1208_v56 = vpop.f32.mrf.mxu1 }
 0x1c4   :  { %v575_v59 = vmax.f32 %v488_v55, 0.0 }
 0x1c5   :  { %v492_v60 = vpop.f32.mrf.mxu1 }
 0x1c6   :  { %v597_v61 = vpack.c.bf16 %v575_v59, %v574_v58  ;;  %v493_v63 = vadd.f32 %v1704_v27, %v492_v60 }
 0x1c7   :  { %v1211_v62 = vpop.f32.mrf.mxu1 }
 0x1c8   :  { %1274 = vmatmul.mubr.bf16.gmra.mxu0 %v597_v61  ;;  %v576_v5 = vmax.f32 %v493_v63, 0.0 }
 0x1c9   :  { %v495_v2 = vpop.f32.mrf.mxu1  ;;  %1277 = vmatprep.mubr.msk.bf16.mxu0 %vm1423_vm0, %v1422_v0 }
 0x1ca   :  { %v496_v3 = vadd.f32 %v1704_v27, %v495_v2 }
 0x1cb   :  { %v1212_v4 = vpop.f32.mrf.mxu1 }
 0x1cc   :  { %v577_v6 = vmax.f32 %v496_v3, 0.0 }
 0x1cd   :  { %v500_v8 = vpop.f32.mrf.mxu1 }
 0x1ce   :  { %v598_v9 = vpack.c.bf16 %v577_v6, %v576_v5  ;;  %v501_v11 = vadd.f32 %v1704_v27, %v500_v8 }
 0x1cf   :  { %v1215_v10 = vpop.f32.mrf.mxu1 }
 0x1d0   :  { %1278 = vmatmul.mubr.bf16.gmra.mxu0 %v598_v9  ;;  %v578_v44 = vmax.f32 %v501_v11, 0.0 }
 0x1d1   :  { %v503_v12 = vpop.f32.mrf.mxu1  ;;  %1281 = vmatprep.mubr.msk.bf16.mxu0 %vm1423_vm0, %v1422_v0 }
 0x1d2   :  { %v504_v38 = vadd.f32 %v1704_v27, %v503_v12 }
 0x1d3   :  { %v1216_v13 = vpop.f32.mrf.mxu1 }
 0x1d4   :  { %v579_v15 = vmax.f32 %v504_v38, 0.0 }
 0x1d5   :  { %v508_v16 = vpop.f32.mrf.mxu1 }
 0x1d6   :  { %v599_v51 = vpack.c.bf16 %v579_v15, %v578_v44  ;;  %v509_v57 = vadd.f32 %v1704_v27, %v508_v16 }
 0x1d7   :  { %v1219_v17 = vpop.f32.mrf.mxu1 }
 0x1d8   :  { %1282 = vmatmul.mubr.bf16.gmra.mxu0 %v599_v51  ;;  %v580_v7 = vmax.f32 %v509_v57, 0.0 }
 0x1d9   :  { %v511_v18 = vpop.f32.mrf.mxu1  ;;  %1285 = vmatprep.mubr.msk.bf16.mxu0 %vm1423_vm0, %v1422_v0 }
 0x1da   :  { %v512_v19 = vadd.f32 %v1704_v27, %v511_v18 }
 0x1db   :  { %v1220_v1 = vpop.f32.mrf.mxu1 }
 0x1dc   :  { %v581_v21 = vmax.f32 %v512_v19, 0.0 }
 0x1dd   :  { %v516_v22 = vpop.f32.mrf.mxu1 }
 0x1de   :  { %v600_v23 = vpack.c.bf16 %v581_v21, %v580_v7  ;;  %v517_v20 = vadd.f32 %v1704_v27, %v516_v22  ;;  %v1758_v22 = vld [vmem:[%s1916_s2 + $0x2] ss:$0 sm:$0xff] }
 0x1df   :  { %v1223_v14 = vpop.f32.mrf.mxu1 }
 0x1e0   :  { %1286 = vmatmul.mubr.bf16.gmra.mxu0 %v600_v23  ;;  %v582_v28 = vmax.f32 %v517_v20, 0.0 }
 0x1e1   :  { %v519_v24 = vpop.f32.mrf.mxu1  ;;  %1289 = vmatprep.mubr.msk.bf16.mxu0 %vm1423_vm0, %v1422_v0 }
 0x1e2   :  { %v520_v25 = vadd.f32 %v1704_v27, %v519_v24 }
 0x1e3   :  { %v1224_v26 = vpop.f32.mrf.mxu1 }
 0x1e4   :  { %v583_v29 = vmax.f32 %v520_v25, 0.0 }
 0x1e5   :  { %v524_v30 = vpop.f32.mrf.mxu1 }
 0x1e6   :  { %v601_v31 = vpack.c.bf16 %v583_v29, %v582_v28  ;;  %v525_v33 = vadd.f32 %v1704_v27, %v524_v30 }
 0x1e7   :  { %v1227_v32 = vpop.f32.mrf.mxu1 }
 0x1e8   :  { %1290 = vmatmul.mubr.bf16.gmra.mxu0 %v601_v31  ;;  %v584_v37 = vmax.f32 %v525_v33, 0.0 }
 0x1e9   :  { %v527_v36 = vpop.f32.mrf.mxu1  ;;  %1293 = vmatprep.mubr.msk.bf16.mxu0 %vm1423_vm0, %v1422_v0 }
 0x1ea   :  { %v528_v34 = vadd.f32 %v1704_v27, %v527_v36 }
 0x1eb   :  { %v1228_v35 = vpop.f32.mrf.mxu1 }
 0x1ec   :  { %v585_v39 = vmax.f32 %v528_v34, 0.0 }
 0x1ed   :  { %v532_v40 = vpop.f32.mrf.mxu1 }
 0x1ee   :  { %v602_v41 = vpack.c.bf16 %v585_v39, %v584_v37  ;;  %v533_v43 = vadd.f32 %v1704_v27, %v532_v40 }
 0x1ef   :  { %v1231_v42 = vpop.f32.mrf.mxu1 }
 0x1f0   :  { %1294 = vmatmul.mubr.bf16.gmra.mxu0 %v602_v41  ;;  %v586_v48 = vmax.f32 %v533_v43, 0.0 }
 0x1f1   :  { %v535_v45 = vpop.f32.mrf.mxu1  ;;  %1297 = vmatprep.mubr.msk.bf16.mxu0 %vm1423_vm0, %v1422_v0 }
 0x1f2   :  { %v536_v46 = vadd.f32 %v1704_v27, %v535_v45 }
 0x1f3   :  { %v1232_v47 = vpop.f32.mrf.mxu1 }
 0x1f4   :  { %v587_v49 = vmax.f32 %v536_v46, 0.0 }
 0x1f5   :  { %v540_v50 = vpop.f32.mrf.mxu1 }
 0x1f6   :  { %v603_v52 = vpack.c.bf16 %v587_v49, %v586_v48  ;;  %v541_v54 = vadd.f32 %v1704_v27, %v540_v50 }
 0x1f7   :  { %v1235_v53 = vpop.f32.mrf.mxu1 }
 0x1f8   :  { %1298 = vmatmul.mubr.bf16.gmra.mxu0 %v603_v52  ;;  %v588_v59 = vmax.f32 %v541_v54, 0.0 }
 0x1f9   :  { %v543_v55 = vpop.f32.mrf.mxu1  ;;  %1301 = vmatprep.mubr.msk.bf16.mxu0 %vm1423_vm0, %v1422_v0 }
 0x1fa   :  { %v544_v56 = vadd.f32 %v1704_v27, %v543_v55 }
 0x1fb   :  { %v1236_v58 = vpop.f32.mrf.mxu1 }
 0x1fc   :  { %v589_v60 = vmax.f32 %v544_v56, 0.0 }
 0x1fd   :  { %v548_v61 = vpop.f32.mrf.mxu1 }
 0x1fe   :  { %v604_v62 = vpack.c.bf16 %v589_v60, %v588_v59  ;;  %v549_v2 = vadd.f32 %v1704_v27, %v548_v61 }
 0x1ff   :  { %v1239_v63 = vpop.f32.mrf.mxu1 }
 0x200   :  { %1302 = vmatmul.mubr.bf16.gmra.mxu0 %v604_v62  ;;  %v590_v6 = vmax.f32 %v549_v2, 0.0 }
 0x201   :  { %v551_v3 = vpop.f32.mrf.mxu1  ;;  %1305 = vmatprep.mubr.msk.bf16.mxu0 %vm1423_vm0, %v1422_v0 }
 0x202   :  { %v552_v4 = vadd.f32 %v1704_v27, %v551_v3 }
 0x203   :  { %v1240_v5 = vpop.f32.mrf.mxu1 }
 0x204   :  { %v591_v8 = vmax.f32 %v552_v4, 0.0 }
 0x205   :  { %v556_v9 = vpop.f32.mrf.mxu1 }
 0x206   :  { %v605_v10 = vpack.c.bf16 %v591_v8, %v590_v6  ;;  %v557_v12 = vadd.f32 %v1704_v27, %v556_v9 }
 0x207   :  { %v1243_v11 = vpop.f32.mrf.mxu1 }
 0x208   :  { %1306 = vmatmul.mubr.bf16.gmra.mxu0 %v605_v10  ;;  %v592_v15 = vmax.f32 %v557_v12, 0.0 }
 0x209   :  { %v559_v38 = vpop.f32.mrf.mxu1  ;;  %1309 = vmatprep.mubr.msk.bf16.mxu0 %vm1423_vm0, %v1422_v0 }
 0x20a   :  { %v560_v13 = vadd.f32 %v1704_v27, %v559_v38 }
 0x20b   :  { %v1244_v44 = vpop.f32.mrf.mxu1 }
 0x20c   :  { %v593_v16 = vmax.f32 %v560_v13, 0.0 }
 0x20d   :  { %v564_v51 = vpop.f32.mrf.mxu1 }
 0x20e   :  { %v606_v17 = vpack.c.bf16 %v593_v16, %v592_v15  ;;  %v565_v57 = vadd.f32 %v1704_v27, %v564_v51 }
 0x20f   :  { %v1247_v18 = vpop.f32.mrf.mxu1 }
 0x210   :  { %v594_v19 = vmax.f32 %v565_v57, 0.0  ;;  %1310 = vmatmul.mubr.bf16.gmra.mxu0 %v606_v17 }
 0x211   :  { %v567_v1 = vpop.f32.mrf.mxu1  ;;  %1313 = vmatprep.mubr.msk.bf16.mxu0 %vm1423_vm0, %v1422_v0  ;;  %v817_v0 = vlaneseq }
 0x212   :  { %v607_v21 = vpack.c.bf16 %v594_v19, %v594_v19 }
 0x213   :  { %v1248_v7 = vpop.f32.mrf.mxu1  ;;  %v818_v31 = vand.u32 127, %v817_v0 }
 0x215   :  { %vm819_vm1 = vcmp.ge.s32.totalorder %v818_v31, 8  ;;  %vm820_vm2 = vcmp.lt.s32.totalorder %v818_v31, 16 }
 0x216   :  { %vm1765_vm3 = vmand %vm819_vm1, %vm820_vm2 }
 0x218   :  { %1314 = vmatmul.mubr.bf16.gmra.mxu0 %v607_v21 }
 0x278   :  { %v715_v23 = vpop.f32.mrf.mxu0 }
 0x279   :  { %v716_v14 = vadd.f32 %v1758_v22, %v715_v23 }
 0x27a   :  { %v1267_v20 = vpop.f32.mrf.mxu0 }
 0x27b   :  { %1372 = vtanh.f32 %v716_v14 }
 0x27c   :  { %v718_v27 = vpop.f32.mrf.mxu0 }
 0x27d   :  { %v719_v24 = vadd.f32 %v1758_v22, %v718_v27 }
 0x27e   :  { %v1268_v25 = vpop.f32.mrf.mxu0 }
 0x27f   :  { %1374 = vtanh.f32 %v719_v24 }
 0x280   :  { %v723_v26 = vpop.f32.mrf.mxu0 }
 0x281   :  { %v724_v28 = vadd.f32 %v1758_v22, %v723_v26 }
 0x282   :  { %v1271_v29 = vpop.f32.mrf.mxu0 }
 0x283   :  { %1376 = vtanh.f32 %v724_v28 }
 0x284   :  { %v726_v30 = vpop.f32.mrf.mxu0 }
 0x285   :  { %v727_v32 = vadd.f32 %v1758_v22, %v726_v30 }
 0x286   :  { %v1272_v33 = vpop.f32.mrf.mxu0 }
 0x287   :  { %1378 = vtanh.f32 %v727_v32 }
 0x288   :  { %v1373_v36 = vpop.eup %1372  ;;  %v731_v34 = vpop.f32.mrf.mxu0 }
 0x289   :  { %v847_v35 = vadd.f32 1.0, %v1373_v36  ;;  %v732_v37 = vadd.f32 %v1758_v22, %v731_v34 }
 0x28a   :  { %v1275_v39 = vpop.f32.mrf.mxu0 }
 0x28b   :  { %v872_v40 = vmul.f32 6.0, %v847_v35  ;;  %1380 = vtanh.f32 %v732_v37 }
 0x28c   :  { %v1375_v41 = vpop.eup %1374  ;;  %v734_v43 = vpop.f32.mrf.mxu0 }
 0x28d   :  { %v897_v45 = vadd.f32 -10.0, %v872_v40  ;;  %v848_v46 = vadd.f32 1.0, %v1375_v41  ;;  %v735_v47 = vadd.f32 %v1758_v22, %v734_v43 }
 0x28e   :  { %v1276_v48 = vpop.f32.mrf.mxu0 }
 0x28f   :  { %v922_v49 = vsel %vm1765_vm3, %v897_v45, %v716_v14  ;;  %v873_v50 = vmul.f32 6.0, %v848_v46  ;;  %1382 = vtanh.f32 %v735_v47 }
 0x290   :  { %v1377_v52 = vpop.eup %1376  ;;  %947 = vst [vmem:[%s1917_s3] sm:$0xff] %v922_v49  ;;  %v739_v53 = vpop.f32.mrf.mxu0 }
 0x291   :  { %v898_v54 = vadd.f32 -10.0, %v873_v50  ;;  %v849_v55 = vadd.f32 1.0, %v1377_v52  ;;  %v740_v56 = vadd.f32 %v1758_v22, %v739_v53 }
 0x292   :  { %v1279_v58 = vpop.f32.mrf.mxu0 }
 0x293   :  { %v923_v59 = vsel %vm1765_vm3, %v898_v54, %v719_v24  ;;  %v874_v60 = vmul.f32 6.0, %v849_v55  ;;  %1384 = vtanh.f32 %v740_v56 }
 0x294   :  { %v1379_v61 = vpop.eup %1378  ;;  %948 = vst [vmem:[%s1917_s3 + $0x8] sm:$0xff] %v923_v59  ;;  %v742_v62 = vpop.f32.mrf.mxu0 }
 0x295   :  { %v899_v63 = vadd.f32 -10.0, %v874_v60  ;;  %v850_v2 = vadd.f32 1.0, %v1379_v61  ;;  %v743_v3 = vadd.f32 %v1758_v22, %v742_v62 }
 0x296   :  { %v1280_v4 = vpop.f32.mrf.mxu0 }
 0x297   :  { %v924_v5 = vsel %vm1765_vm3, %v899_v63, %v724_v28  ;;  %v875_v6 = vmul.f32 6.0, %v850_v2  ;;  %1386 = vtanh.f32 %v743_v3 }
 0x298   :  { %v1381_v8 = vpop.eup %1380  ;;  %949 = vst [vmem:[%s1917_s3 + $0x10] sm:$0xff] %v924_v5  ;;  %v747_v9 = vpop.f32.mrf.mxu0 }
 0x299   :  { %v900_v10 = vadd.f32 -10.0, %v875_v6  ;;  %v851_v11 = vadd.f32 1.0, %v1381_v8  ;;  %v748_v12 = vadd.f32 %v1758_v22, %v747_v9 }
 0x29a   :  { %v1283_v38 = vpop.f32.mrf.mxu0 }
 0x29b   :  { %v925_v13 = vsel %vm1765_vm3, %v900_v10, %v727_v32  ;;  %v876_v44 = vmul.f32 6.0, %v851_v11  ;;  %1388 = vtanh.f32 %v748_v12 }
 0x29c   :  { %v1383_v15 = vpop.eup %1382  ;;  %950 = vst [vmem:[%s1917_s3 + $0x18] sm:$0xff] %v925_v13  ;;  %v750_v16 = vpop.f32.mrf.mxu0 }
 0x29d   :  { %v901_v51 = vadd.f32 -10.0, %v876_v44  ;;  %v852_v17 = vadd.f32 1.0, %v1383_v15  ;;  %v751_v57 = vadd.f32 %v1758_v22, %v750_v16 }
 0x29e   :  { %v1284_v18 = vpop.f32.mrf.mxu0 }
 0x29f   :  { %v926_v19 = vsel %vm1765_vm3, %v901_v51, %v732_v37  ;;  %v877_v1 = vmul.f32 6.0, %v852_v17  ;;  %1390 = vtanh.f32 %v751_v57 }
 0x2a0   :  { %v1385_v7 = vpop.eup %1384  ;;  %951 = vst [vmem:[%s1917_s3 + $0x20] sm:$0xff] %v926_v19  ;;  %v755_v21 = vpop.f32.mrf.mxu0 }
 0x2a1   :  { %v902_v23 = vadd.f32 -10.0, %v877_v1  ;;  %v853_v14 = vadd.f32 1.0, %v1385_v7  ;;  %v756_v20 = vadd.f32 %v1758_v22, %v755_v21 }
 0x2a2   :  { %v1287_v27 = vpop.f32.mrf.mxu0 }
 0x2a3   :  { %v927_v24 = vsel %vm1765_vm3, %v902_v23, %v735_v47  ;;  %v878_v25 = vmul.f32 6.0, %v853_v14  ;;  %1392 = vtanh.f32 %v756_v20 }
 0x2a4   :  { %v1387_v26 = vpop.eup %1386  ;;  %952 = vst [vmem:[%s1917_s3 + $0x28] sm:$0xff] %v927_v24  ;;  %v758_v0 = vpop.f32.mrf.mxu0 }
 0x2a5   :  { %v903_v28 = vadd.f32 -10.0, %v878_v25  ;;  %v854_v29 = vadd.f32 1.0, %v1387_v26  ;;  %v759_v30 = vadd.f32 %v1758_v22, %v758_v0 }
 0x2a6   :  { %v1288_v31 = vpop.f32.mrf.mxu0 }
 0x2a7   :  { %v928_v32 = vsel %vm1765_vm3, %v903_v28, %v740_v56  ;;  %v879_v33 = vmul.f32 6.0, %v854_v29  ;;  %1394 = vtanh.f32 %v759_v30 }
 0x2a8   :  { %v1389_v36 = vpop.eup %1388  ;;  %953 = vst [vmem:[%s1917_s3 + $0x30] sm:$0xff] %v928_v32  ;;  %v763_v34 = vpop.f32.mrf.mxu0 }
 0x2a9   :  { %v904_v35 = vadd.f32 -10.0, %v879_v33  ;;  %v855_v37 = vadd.f32 1.0, %v1389_v36  ;;  %v764_v39 = vadd.f32 %v1758_v22, %v763_v34 }
 0x2aa   :  { %v1291_v40 = vpop.f32.mrf.mxu0 }
 0x2ab   :  { %v929_v41 = vsel %vm1765_vm3, %v904_v35, %v743_v3  ;;  %v880_v43 = vmul.f32 6.0, %v855_v37  ;;  %1396 = vtanh.f32 %v764_v39 }
 0x2ac   :  { %v1391_v45 = vpop.eup %1390  ;;  %954 = vst [vmem:[%s1917_s3 + $0x38] sm:$0xff] %v929_v41  ;;  %v766_v46 = vpop.f32.mrf.mxu0 }
 0x2ad   :  { %v905_v47 = vadd.f32 -10.0, %v880_v43  ;;  %v856_v48 = vadd.f32 1.0, %v1391_v45  ;;  %v767_v49 = vadd.f32 %v1758_v22, %v766_v46 }
 0x2ae   :  { %v1292_v50 = vpop.f32.mrf.mxu0 }
 0x2af   :  { %v930_v52 = vsel %vm1765_vm3, %v905_v47, %v748_v12  ;;  %v881_v53 = vmul.f32 6.0, %v856_v48  ;;  %1398 = vtanh.f32 %v767_v49 }
 0x2b0   :  { %v1393_v54 = vpop.eup %1392  ;;  %955 = vst [vmem:[%s1917_s3 + $0x40] sm:$0xff] %v930_v52  ;;  %v771_v55 = vpop.f32.mrf.mxu0 }
 0x2b1   :  { %v906_v56 = vadd.f32 -10.0, %v881_v53  ;;  %v857_v58 = vadd.f32 1.0, %v1393_v54  ;;  %v772_v59 = vadd.f32 %v1758_v22, %v771_v55 }
 0x2b2   :  { %v1295_v60 = vpop.f32.mrf.mxu0 }
 0x2b3   :  { %v931_v61 = vsel %vm1765_vm3, %v906_v56, %v751_v57  ;;  %v882_v62 = vmul.f32 6.0, %v857_v58  ;;  %1400 = vtanh.f32 %v772_v59 }
 0x2b4   :  { %v1395_v63 = vpop.eup %1394  ;;  %956 = vst [vmem:[%s1917_s3 + $0x48] sm:$0xff] %v931_v61  ;;  %v774_v2 = vpop.f32.mrf.mxu0 }
 0x2b5   :  { %v907_v3 = vadd.f32 -10.0, %v882_v62  ;;  %v858_v4 = vadd.f32 1.0, %v1395_v63  ;;  %v775_v5 = vadd.f32 %v1758_v22, %v774_v2 }
 0x2b6   :  { %v1296_v6 = vpop.f32.mrf.mxu0 }
 0x2b7   :  { %v932_v8 = vsel %vm1765_vm3, %v907_v3, %v756_v20  ;;  %v883_v9 = vmul.f32 6.0, %v858_v4  ;;  %1402 = vtanh.f32 %v775_v5 }
 0x2b8   :  { %v1397_v10 = vpop.eup %1396  ;;  %957 = vst [vmem:[%s1917_s3 + $0x50] sm:$0xff] %v932_v8  ;;  %v779_v11 = vpop.f32.mrf.mxu0 }
 0x2b9   :  { %v908_v12 = vadd.f32 -10.0, %v883_v9  ;;  %v859_v38 = vadd.f32 1.0, %v1397_v10  ;;  %v780_v13 = vadd.f32 %v1758_v22, %v779_v11 }
 0x2ba   :  { %v1299_v44 = vpop.f32.mrf.mxu0 }
 0x2bb   :  { %v933_v15 = vsel %vm1765_vm3, %v908_v12, %v759_v30  ;;  %v884_v16 = vmul.f32 6.0, %v859_v38  ;;  %1404 = vtanh.f32 %v780_v13 }
 0x2bc   :  { %v1399_v51 = vpop.eup %1398  ;;  %958 = vst [vmem:[%s1917_s3 + $0x58] sm:$0xff] %v933_v15  ;;  %v782_v17 = vpop.f32.mrf.mxu0 }
 0x2bd   :  { %v909_v57 = vadd.f32 -10.0, %v884_v16  ;;  %v860_v18 = vadd.f32 1.0, %v1399_v51  ;;  %v783_v19 = vadd.f32 %v1758_v22, %v782_v17 }
 0x2be   :  { %v1300_v1 = vpop.f32.mrf.mxu0 }
 0x2bf   :  { %v934_v7 = vsel %vm1765_vm3, %v909_v57, %v764_v39  ;;  %v885_v21 = vmul.f32 6.0, %v860_v18  ;;  %1406 = vtanh.f32 %v783_v19 }
 0x2c0   :  { %v1401_v23 = vpop.eup %1400  ;;  %959 = vst [vmem:[%s1917_s3 + $0x60] sm:$0xff] %v934_v7  ;;  %v787_v14 = vpop.f32.mrf.mxu0 }
 0x2c1   :  { %v910_v20 = vadd.f32 -10.0, %v885_v21  ;;  %v861_v27 = vadd.f32 1.0, %v1401_v23  ;;  %v788_v24 = vadd.f32 %v1758_v22, %v787_v14 }
 0x2c2   :  { %v1303_v25 = vpop.f32.mrf.mxu0 }
 0x2c3   :  { %v935_v26 = vsel %vm1765_vm3, %v910_v20, %v767_v49  ;;  %v886_v0 = vmul.f32 6.0, %v861_v27  ;;  %1408 = vtanh.f32 %v788_v24 }
 0x2c4   :  { %v1403_v28 = vpop.eup %1402  ;;  %960 = vst [vmem:[%s1917_s3 + $0x68] sm:$0xff] %v935_v26  ;;  %v790_v29 = vpop.f32.mrf.mxu0 }
 0x2c5   :  { %v911_v30 = vadd.f32 -10.0, %v886_v0  ;;  %v862_v31 = vadd.f32 1.0, %v1403_v28  ;;  %v791_v32 = vadd.f32 %v1758_v22, %v790_v29 }
 0x2c6   :  { %v1304_v33 = vpop.f32.mrf.mxu0 }
 0x2c7   :  { %v936_v36 = vsel %vm1765_vm3, %v911_v30, %v772_v59  ;;  %v887_v34 = vmul.f32 6.0, %v862_v31  ;;  %1410 = vtanh.f32 %v791_v32 }
 0x2c8   :  { %v1405_v35 = vpop.eup %1404  ;;  %961 = vst [vmem:[%s1917_s3 + $0x70] sm:$0xff] %v936_v36  ;;  %v795_v37 = vpop.f32.mrf.mxu0 }
 0x2c9   :  { %v912_v39 = vadd.f32 -10.0, %v887_v34  ;;  %v863_v40 = vadd.f32 1.0, %v1405_v35  ;;  %v796_v41 = vadd.f32 %v1758_v22, %v795_v37 }
 0x2ca   :  { %v1307_v43 = vpop.f32.mrf.mxu0 }
 0x2cb   :  { %v937_v45 = vsel %vm1765_vm3, %v912_v39, %v775_v5  ;;  %v888_v46 = vmul.f32 6.0, %v863_v40  ;;  %1412 = vtanh.f32 %v796_v41 }
 0x2cc   :  { %v1407_v47 = vpop.eup %1406  ;;  %962 = vst [vmem:[%s1917_s3 + $0x78] sm:$0xff] %v937_v45  ;;  %v798_v48 = vpop.f32.mrf.mxu0 }
 0x2cd   :  { %v913_v49 = vadd.f32 -10.0, %v888_v46  ;;  %v864_v50 = vadd.f32 1.0, %v1407_v47  ;;  %v799_v52 = vadd.f32 %v1758_v22, %v798_v48 }
 0x2ce   :  { %v1308_v53 = vpop.f32.mrf.mxu0 }
 0x2cf   :  { %v938_v54 = vsel %vm1765_vm3, %v913_v49, %v780_v13  ;;  %v889_v55 = vmul.f32 6.0, %v864_v50  ;;  %1414 = vtanh.f32 %v799_v52 }
 0x2d0   :  { %v1409_v56 = vpop.eup %1408  ;;  %963 = vst [vmem:[%s1917_s3 + $0x80] sm:$0xff] %v938_v54  ;;  %v803_v58 = vpop.f32.mrf.mxu0 }
 0x2d1   :  { %v914_v59 = vadd.f32 -10.0, %v889_v55  ;;  %v865_v60 = vadd.f32 1.0, %v1409_v56  ;;  %v804_v61 = vadd.f32 %v1758_v22, %v803_v58 }
 0x2d2   :  { %v1311_v62 = vpop.f32.mrf.mxu0 }
 0x2d3   :  { %v939_v63 = vsel %vm1765_vm3, %v914_v59, %v783_v19  ;;  %v890_v2 = vmul.f32 6.0, %v865_v60  ;;  %1416 = vtanh.f32 %v804_v61 }
 0x2d4   :  { %v1411_v3 = vpop.eup %1410  ;;  %964 = vst [vmem:[%s1917_s3 + $0x88] sm:$0xff] %v939_v63  ;;  %v806_v4 = vpop.f32.mrf.mxu0 }
 0x2d5   :  { %v915_v5 = vadd.f32 -10.0, %v890_v2  ;;  %v866_v6 = vadd.f32 1.0, %v1411_v3  ;;  %v807_v8 = vadd.f32 %v1758_v22, %v806_v4 }
 0x2d6   :  { %v1312_v9 = vpop.f32.mrf.mxu0 }
 0x2d7   :  { %v940_v10 = vsel %vm1765_vm3, %v915_v5, %v788_v24  ;;  %v891_v11 = vmul.f32 6.0, %v866_v6  ;;  %1418 = vtanh.f32 %v807_v8 }
 0x2d8   :  { %v1413_v12 = vpop.eup %1412  ;;  %965 = vst [vmem:[%s1917_s3 + $0x90] sm:$0xff] %v940_v10  ;;  %v811_v38 = vpop.f32.mrf.mxu0 }
 0x2d9   :  { %v916_v13 = vadd.f32 -10.0, %v891_v11  ;;  %v867_v44 = vadd.f32 1.0, %v1413_v12  ;;  %v812_v15 = vadd.f32 %v1758_v22, %v811_v38 }
 0x2da   :  { %v1315_v16 = vpop.f32.mrf.mxu0 }
 0x2db   :  { %v941_v51 = vsel %vm1765_vm3, %v916_v13, %v791_v32  ;;  %v892_v17 = vmul.f32 6.0, %v867_v44  ;;  %1420 = vtanh.f32 %v812_v15 }
 0x2dc   :  { %v1415_v57 = vpop.eup %1414  ;;  %966 = vst [vmem:[%s1917_s3 + $0x98] sm:$0xff] %v941_v51  ;;  %v814_v18 = vpop.f32.mrf.mxu0 }
 0x2dd   :  { %v917_v19 = vadd.f32 -10.0, %v892_v17  ;;  %v868_v1 = vadd.f32 1.0, %v1415_v57 }
 0x2de   :  { %v1316_v7 = vpop.f32.mrf.mxu0 }
 0x2df   :  { %v942_v21 = vsel %vm1765_vm3, %v917_v19, %v796_v41  ;;  %v893_v23 = vmul.f32 6.0, %v868_v1 }
 0x2e0   :  { %v1417_v22 = vpop.eup %1416  ;;  %967 = vst [vmem:[%s1917_s3 + $0xa0] sm:$0xff] %v942_v21 }
 0x2e1   :  { %v918_v14 = vadd.f32 -10.0, %v893_v23  ;;  %v869_v20 = vadd.f32 1.0, %v1417_v22 }
 0x2e3   :  { %v943_v27 = vsel %vm1765_vm3, %v918_v14, %v799_v52  ;;  %v894_v24 = vmul.f32 6.0, %v869_v20 }
 0x2e4   :  { %v1419_v25 = vpop.eup %1418  ;;  %968 = vst [vmem:[%s1917_s3 + $0xa8] sm:$0xff] %v943_v27 }
 0x2e5   :  { %v919_v26 = vadd.f32 -10.0, %v894_v24  ;;  %v870_v0 = vadd.f32 1.0, %v1419_v25 }
 0x2e7   :  { %v944_v28 = vsel %vm1765_vm3, %v919_v26, %v804_v61  ;;  %v895_v29 = vmul.f32 6.0, %v870_v0 }
 0x2e8   :  { %v1421_v30 = vpop.eup %1420  ;;  %969 = vst [vmem:[%s1917_s3 + $0xb0] sm:$0xff] %v944_v28 }
 0x2e9   :  { %v920_v31 = vadd.f32 -10.0, %v895_v29  ;;  %v871_v32 = vadd.f32 1.0, %v1421_v30 }
 0x2eb   :  { %v945_v33 = vsel %vm1765_vm3, %v920_v31, %v807_v8  ;;  %v896_v36 = vmul.f32 6.0, %v871_v32 }
 0x2ec   :  { %970 = vst [vmem:[%s1917_s3 + $0xb8] sm:$0xff] %v945_v33 }
 0x2ed   :  { %v921_v34 = vadd.f32 -10.0, %v896_v36 }
 0x2ef   :  { %v946_v35 = vsel %vm1765_vm3, %v921_v34, %v812_v15 }
 0x2f0   :  { %971 = vst [vmem:[%s1917_s3 + $0xc0] sm:$0xff] %v946_v35 }

</bundles_post_ra>
